<compile_context>
chip_gen: v7x
topology: tpu7x:2x2x1
jax: 0.10.0
libtpu: 0.0.40
codegen_flags: <defaults>
</compile_context>

<pallas_src>
import jax
import jax.numpy as jnp
import numpy as np
from jax.experimental import pallas as pl
from jax.experimental.pallas import tpu as pltpu


def _make_basic_block_kernel(N, H, W, C, eps):
    """Fused BasicBlock kernel for fixed (N, H, W, C); packed-row slab layout."""
    H2 = H // 2
    R = N * H2              # sublane rows of the slab
    L = 2 * W * C           # lanes of the slab (two image rows side by side)
    M = N * H * W           # positions per channel for BN statistics
    inv_m = 1.0 / M

    def conv3x3(slab, w_ref, keep_up, keep_dn):
        # slab: (R, L).  w_ref: (3, L, L) banded weights for packed-row offsets
        # d = -1, 0, +1:  out[r] = slab[r-1]@B[-1] + slab[r]@B[0] + slab[r+1]@B[+1]
        p0 = jnp.dot(slab, w_ref[1], preferred_element_type=jnp.float32)
        pm = jnp.dot(slab, w_ref[0], preferred_element_type=jnp.float32)
        pp = jnp.dot(slab, w_ref[2], preferred_element_type=jnp.float32)
        # Shift the RESULTS by one packed row (value concat -> no scratch stores,
        # no relayout copies); wrapped rows land on image-boundary rows and are
        # masked off below, which also implements the top/bottom zero padding.
        pm_dn = jnp.concatenate([pm[R - 1:R, :], pm[:R - 1, :]], axis=0)  # [r]=pm[r-1]
        pp_up = jnp.concatenate([pp[1:, :], pp[:1, :]], axis=0)           # [r]=pp[r+1]
        return p0 + jnp.where(keep_up, pm_dn, 0.0) + jnp.where(keep_dn, pp_up, 0.0)

    def bn_relu(acc, gamma, beta, pool, pool_t, residual=None):
        # Train-mode BatchNorm (biased variance), mean/beta folded into a single
        # per-channel affine; 2 pool matmuls total instead of 5.
        s1 = jnp.sum(acc, axis=0, keepdims=True)            # (1, L)
        s2 = jnp.sum(acc * acc, axis=0, keepdims=True)      # (1, L)
        stats_c = jnp.dot(jnp.concatenate([s1, s2], axis=0), pool,
                          preferred_element_type=jnp.float32) * jnp.float32(inv_m)
        mean_c = stats_c[0:1, :]                            # (1, C)
        var_c = stats_c[1:2, :] - mean_c * mean_c           # single-pass var (f32 ok)
        a_c = gamma * jax.lax.rsqrt(var_c + jnp.float32(eps))
        b_c = beta - mean_c * a_c
        ab_l = jnp.dot(jnp.concatenate([a_c, b_c], axis=0), pool_t,
                       preferred_element_type=jnp.float32)  # (2, L)
        out = acc * ab_l[0:1, :] + ab_l[1:2, :]             # one FMA over the slab
        if residual is not None:
            out = out + residual
        return jnp.maximum(out, 0.0)

    def kernel(x_ref, w1_ref, w2_ref, g1_ref, b1_ref, g2_ref, b2_ref,
               pool_ref, pool_t_ref, out_ref):
        pool = pool_ref[...]
        pool_t = pool_t_ref[...]
        # Image-boundary row masks (shared by both convs; hoisted).
        h2 = jax.lax.broadcasted_iota(jnp.int32, (R, L), 0) % H2
        keep_up = h2 != 0          # drop d=-1 contribution on image-top rows
        keep_dn = h2 != H2 - 1     # drop d=+1 contribution on image-bottom rows

        x = x_ref[...]
        # conv1 -> bn1 -> relu (intermediate never leaves VMEM/vregs)
        h = bn_relu(conv3x3(x, w1_ref, keep_up, keep_dn),
                    g1_ref[...], b1_ref[...], pool, pool_t)
        # conv2 -> bn2 -> +identity -> relu
        out_ref[...] = bn_relu(conv3x3(h, w2_ref, keep_up, keep_dn),
                               g2_ref[...], b2_ref[...], pool, pool_t,
                               residual=x)

    return kernel


def basic_block_forward(x_nchw, params, eps=1e-5):
    """BasicBlock.forward (stride=1, downsample=None). Input/output are NCHW."""
    N, Cin, H, W = x_nchw.shape
    C = params["g1"].shape[1]
    assert Cin == C, "stride=1 / downsample=None BasicBlock requires Cin == Cout"
    assert H % 2 == 0, "packed-row layout needs even H"  # TODO(synk): odd-H tail row
    R, L = N * H // 2, 2 * W * C

    # NCHW -> NHWC -> packed (N*H/2, 2*W*C) lane-dense slab (flat reshape after
    # the transpose; in a full network keep the model NHWC end-to-end).
    x_slab = jnp.transpose(x_nchw, (0, 2, 3, 1)).reshape(R, L)

    kernel = _make_basic_block_kernel(N, H, W, C, eps)
    vmem = pl.BlockSpec(memory_space=pltpu.MemorySpace.VMEM)
    out_slab = pl.pallas_call(
        kernel,
        out_shape=jax.ShapeDtypeStruct((R, L), jnp.float32),
        in_specs=[vmem] * 9,
        out_specs=vmem,
    )(x_slab, params["w1"], params["w2"], params["g1"], params["b1"],
      params["g2"], params["b2"], params["pool"], params["pool_t"])

    return jnp.transpose(out_slab.reshape(N, H, W, C), (0, 3, 1, 2))


def _packed_bands(w_oihw, W):
    """Torch OIHW (Cout,Cin,3,3) -> (3, 2*W*Cin, 2*W*Cout) banded matrices for
    packed-row offsets d = -1, 0, +1.

    Slab lane layout: lane = half*W*C + x*C + c, where `half` selects the even
    (0) or odd (1) image row stored in that sublane row.  Horizontal zero
    padding is realized as structural zeros (missing boundary columns), so no
    lane halo and no padded scratch are needed.
    """
    cout, cin, KH, KW = w_oihw.shape
    w = np.asarray(w_oihw, np.float32)
    Li, Lo = 2 * W * cin, 2 * W * cout
    bands = np.zeros((3, Li, Lo), np.float32)

    def add(d, q, p, ky):
        # output half p at packed-row offset d reads input half q with kernel row ky
        for xo in range(W):
            for kx in range(KW):
                xi = xo + kx - 1
                if 0 <= xi < W:
                    bands[d + 1,
                          q * W * cin + xi * cin:q * W * cin + (xi + 1) * cin,
                          p * W * cout + xo * cout:p * W * cout + (xo + 1) * cout] \
                        = w[:, :, ky, kx].T

    add(-1, 1, 0, 0)                                                    # row above pair
    add(0, 0, 0, 1); add(0, 1, 0, 2); add(0, 0, 1, 0); add(0, 1, 1, 1)  # within pair
    add(1, 0, 1, 2)                                                     # row below pair
    return jnp.asarray(bands)


def _channel_pool(L, C):
    """(L, C) one-hot: column c sums every lane holding channel c (forward) /
    broadcasts a per-channel scalar to all its lanes (transposed)."""
    p = np.zeros((L, C), np.float32)
    p[np.arange(L), np.arange(L) % C] = 1.0
    return p


def _reference_forward(x, w1, w2, g1, b1, g2, b2, eps=1e-5):
    """Pure-JAX reference (NCHW, train-mode BN with affine)."""

    def conv(x, w):
        return jax.lax.conv_general_dilated(
            x, w, window_strides=(1, 1), padding=((1, 1), (1, 1)),
            dimension_numbers=("NCHW", "OIHW", "NCHW"))

    def bn(x, g, b):
        mean = jnp.mean(x, axis=(0, 2, 3), keepdims=True)
        var = jnp.mean((x - mean) ** 2, axis=(0, 2, 3), keepdims=True)
        xn = (x - mean) / jnp.sqrt(var + eps)
        return xn * g.reshape(1, -1, 1, 1) + b.reshape(1, -1, 1, 1)

    out = jax.nn.relu(bn(conv(x, w1), g1, b1))
    out = bn(conv(out, w2), g2, b2) + x
    return jax.nn.relu(out)


if __name__ == "__main__":
    # BasicBlock(inplanes=4, planes=4, stride=1, downsample=None)
    N, C, H, W = 2, 4, 16, 16

    key = jax.random.PRNGKey(0)
    kx, kw1, kw2, kg1, kb1, kg2, kb2 = jax.random.split(key, 7)
    x_nchw = jax.random.normal(kx, (N, C, H, W), dtype=jnp.float32)

    # Deterministic Kaiming-style conv weights, PyTorch OIHW shape (C, C, 3, 3).
    fan_in = C * 3 * 3
    w1_oihw = jax.random.normal(kw1, (C, C, 3, 3), jnp.float32) * np.sqrt(2.0 / fan_in)
    w2_oihw = jax.random.normal(kw2, (C, C, 3, 3), jnp.float32) * np.sqrt(2.0 / fan_in)

    # Non-default BN affine params so the gamma/beta path is actually tested.
    g1 = 1.0 + 0.1 * jax.random.normal(kg1, (C,), jnp.float32)
    b1 = 0.1 * jax.random.normal(kb1, (C,), jnp.float32)
    g2 = 1.0 + 0.1 * jax.random.normal(kg2, (C,), jnp.float32)
    b2 = 0.1 * jax.random.normal(kb2, (C,), jnp.float32)

    L = 2 * W * C
    pool_np = _channel_pool(L, C)
    params = {
        "w1": _packed_bands(w1_oihw, W),
        "w2": _packed_bands(w2_oihw, W),
        "g1": g1.reshape(1, C), "b1": b1.reshape(1, C),
        "g2": g2.reshape(1, C), "b2": b2.reshape(1, C),
        "pool": jnp.asarray(pool_np),
        "pool_t": jnp.asarray(pool_np.T.copy()),
    }

    fwd = jax.jit(basic_block_forward)
    out = jax.block_until_ready(fwd(x_nchw, params))
    ref = jax.block_until_ready(
        _reference_forward(x_nchw, w1_oihw, w2_oihw, g1, b1, g2, b2))

    assert out.shape == (N, C, H, W), out.shape
    np.testing.assert_allclose(np.asarray(out), np.asarray(ref),
                               rtol=1e-4, atol=1e-4)
    print("KERNEL_OK")
</pallas_src>

<mosaic_0001>
module attributes {stable_mosaic.version = 11 : i64} {
  func.func @kernel(%arg0: memref<16x128xf32, #tpu.memory_space<vmem>>, %arg1: memref<3x128x128xf32, #tpu.memory_space<vmem>>, %arg2: memref<3x128x128xf32, #tpu.memory_space<vmem>>, %arg3: memref<1x4xf32, #tpu.memory_space<vmem>>, %arg4: memref<1x4xf32, #tpu.memory_space<vmem>>, %arg5: memref<1x4xf32, #tpu.memory_space<vmem>>, %arg6: memref<1x4xf32, #tpu.memory_space<vmem>>, %arg7: memref<128x4xf32, #tpu.memory_space<vmem>>, %arg8: memref<4x128xf32, #tpu.memory_space<vmem>>, %arg9: memref<16x128xf32, #tpu.memory_space<vmem>>) attributes {dimension_semantics = [], scalar_prefetch = 0 : i64, scratch_operands = 0 : i64, tpu.core_type = #tpu.core_type<tc>} {
    %c0 = arith.constant 0 : index
    %c0_0 = arith.constant 0 : index
    %0 = vector.load %arg7[%c0, %c0_0] : memref<128x4xf32, #tpu.memory_space<vmem>>, vector<128x4xf32>
    %c0_1 = arith.constant 0 : index
    %c0_2 = arith.constant 0 : index
    %1 = vector.load %arg8[%c0_1, %c0_2] : memref<4x128xf32, #tpu.memory_space<vmem>>, vector<4x128xf32>
    %2 = tpu.iota {dimensions = array<i32: 0>} : vector<16x128xi32>
    %c8_i32 = arith.constant 8 : i32
    %c0_i32 = arith.constant 0 : i32
    %3 = arith.cmpi eq, %c8_i32, %c0_i32 : i32
    %c1_i32 = arith.constant 1 : i32
    %4 = arith.select %3, %c1_i32, %c8_i32 : i32
    %5 = vector.broadcast %4 : i32 to vector<16x128xi32>
    %6 = arith.remsi %2, %5 : vector<16x128xi32>
    %c0_i32_3 = arith.constant 0 : i32
    %7 = vector.broadcast %c0_i32_3 : i32 to vector<16x128xi32>
    %8 = arith.cmpi ne, %6, %7 : vector<16x128xi32>
    %c0_i32_4 = arith.constant 0 : i32
    %9 = vector.broadcast %c0_i32_4 : i32 to vector<16x128xi32>
    %10 = arith.cmpi slt, %6, %9 : vector<16x128xi32>
    %c0_i32_5 = arith.constant 0 : i32
    %11 = arith.cmpi slt, %4, %c0_i32_5 : i32
    %12 = vector.broadcast %11 : i1 to vector<16x128xi1>
    %13 = vector.broadcast %12 : vector<16x128xi1> to vector<16x128xi1>
    %14 = arith.xori %10, %13 : vector<16x128xi1>
    %15 = arith.andi %14, %8 : vector<16x128xi1>
    %16 = vector.broadcast %4 : i32 to vector<16x128xi32>
    %17 = arith.addi %6, %16 : vector<16x128xi32>
    %18 = arith.select %15, %17, %6 : vector<16x128xi1>, vector<16x128xi32>
    %c0_i32_6 = arith.constant 0 : i32
    %19 = vector.broadcast %c0_i32_6 : i32 to vector<16x128xi32>
    %20 = arith.cmpi ne, %18, %19 : vector<16x128xi32>
    %c7_i32 = arith.constant 7 : i32
    %21 = vector.broadcast %c7_i32 : i32 to vector<16x128xi32>
    %22 = arith.cmpi ne, %18, %21 : vector<16x128xi32>
    %c0_7 = arith.constant 0 : index
    %c0_8 = arith.constant 0 : index
    %23 = vector.load %arg0[%c0_7, %c0_8] : memref<16x128xf32, #tpu.memory_space<vmem>>, vector<16x128xf32>
    %c1 = arith.constant 1 : index
    %c0_9 = arith.constant 0 : index
    %c0_10 = arith.constant 0 : index
    %24 = vector.load %arg1[%c1, %c0_9, %c0_10] : memref<3x128x128xf32, #tpu.memory_space<vmem>>, vector<1x128x128xf32>
    %25 = vector.shape_cast %24 : vector<1x128x128xf32> to vector<128x128xf32>
    %cst = arith.constant dense<0.000000e+00> : vector<16x128xf32>
    %26 = tpu.matmul %23, %25, %cst {dimension_numbers = #tpu.dot_dimension_numbers<[1], [0], [0], [1], [0, 0, 1, 1], [], []>} : vector<16x128xf32>, vector<128x128xf32>, vector<16x128xf32> -> vector<16x128xf32>
    %c0_11 = arith.constant 0 : index
    %c0_12 = arith.constant 0 : index
    %c0_13 = arith.constant 0 : index
    %27 = vector.load %arg1[%c0_11, %c0_12, %c0_13] : memref<3x128x128xf32, #tpu.memory_space<vmem>>, vector<1x128x128xf32>
    %28 = vector.shape_cast %27 : vector<1x128x128xf32> to vector<128x128xf32>
    %cst_14 = arith.constant dense<0.000000e+00> : vector<16x128xf32>
    %29 = tpu.matmul %23, %28, %cst_14 {dimension_numbers = #tpu.dot_dimension_numbers<[1], [0], [0], [1], [0, 0, 1, 1], [], []>} : vector<16x128xf32>, vector<128x128xf32>, vector<16x128xf32> -> vector<16x128xf32>
    %c2 = arith.constant 2 : index
    %c0_15 = arith.constant 0 : index
    %c0_16 = arith.constant 0 : index
    %30 = vector.load %arg1[%c2, %c0_15, %c0_16] : memref<3x128x128xf32, #tpu.memory_space<vmem>>, vector<1x128x128xf32>
    %31 = vector.shape_cast %30 : vector<1x128x128xf32> to vector<128x128xf32>
    %cst_17 = arith.constant dense<0.000000e+00> : vector<16x128xf32>
    %32 = tpu.matmul %23, %31, %cst_17 {dimension_numbers = #tpu.dot_dimension_numbers<[1], [0], [0], [1], [0, 0, 1, 1], [], []>} : vector<16x128xf32>, vector<128x128xf32>, vector<16x128xf32> -> vector<16x128xf32>
    %33 = vector.extract_strided_slice %29 {offsets = [15, 0], sizes = [1, 128], strides = [1, 1]} : vector<16x128xf32> to vector<1x128xf32>
    %34 = vector.extract_strided_slice %29 {offsets = [0, 0], sizes = [15, 128], strides = [1, 1]} : vector<16x128xf32> to vector<15x128xf32>
    %35 = tpu.concatenate %33, %34 in 0 : vector<1x128xf32>, vector<15x128xf32> -> vector<16x128xf32>
    %36 = vector.extract_strided_slice %32 {offsets = [1, 0], sizes = [15, 128], strides = [1, 1]} : vector<16x128xf32> to vector<15x128xf32>
    %37 = vector.extract_strided_slice %32 {offsets = [0, 0], sizes = [1, 128], strides = [1, 1]} : vector<16x128xf32> to vector<1x128xf32>
    %38 = tpu.concatenate %36, %37 in 0 : vector<15x128xf32>, vector<1x128xf32> -> vector<16x128xf32>
    %cst_18 = arith.constant 0.000000e+00 : f32
    %39 = vector.broadcast %cst_18 : f32 to vector<16x128xf32>
    %40 = arith.select %20, %35, %39 : vector<16x128xi1>, vector<16x128xf32>
    %41 = arith.addf %26, %40 : vector<16x128xf32>
    %cst_19 = arith.constant 0.000000e+00 : f32
    %42 = vector.broadcast %cst_19 : f32 to vector<16x128xf32>
    %43 = arith.select %22, %38, %42 : vector<16x128xi1>, vector<16x128xf32>
    %44 = arith.addf %41, %43 : vector<16x128xf32>
    %c0_20 = arith.constant 0 : index
    %c0_21 = arith.constant 0 : index
    %45 = vector.load %arg3[%c0_20, %c0_21] : memref<1x4xf32, #tpu.memory_space<vmem>>, vector<1x4xf32>
    %c0_22 = arith.constant 0 : index
    %c0_23 = arith.constant 0 : index
    %46 = vector.load %arg4[%c0_22, %c0_23] : memref<1x4xf32, #tpu.memory_space<vmem>>, vector<1x4xf32>
    %cst_24 = arith.constant dense<0.000000e+00> : vector<128xf32>
    %47 = vector.multi_reduction <add>, %44, %cst_24 [0] : vector<16x128xf32> to vector<128xf32>
    %48 = vector.shape_cast %47 : vector<128xf32> to vector<1x128xf32>
    %49 = arith.mulf %44, %44 : vector<16x128xf32>
    %cst_25 = arith.constant dense<0.000000e+00> : vector<128xf32>
    %50 = vector.multi_reduction <add>, %49, %cst_25 [0] : vector<16x128xf32> to vector<128xf32>
    %51 = vector.shape_cast %50 : vector<128xf32> to vector<1x128xf32>
    %52 = tpu.concatenate %48, %51 in 0 : vector<1x128xf32>, vector<1x128xf32> -> vector<2x128xf32>
    %cst_26 = arith.constant dense<0.000000e+00> : vector<2x4xf32>
    %53 = tpu.matmul %52, %0, %cst_26 {dimension_numbers = #tpu.dot_dimension_numbers<[1], [0], [0], [1], [0, 0, 1, 1], [], []>} : vector<2x128xf32>, vector<128x4xf32>, vector<2x4xf32> -> vector<2x4xf32>
    %cst_27 = arith.constant 0.001953125 : f32
    %54 = vector.broadcast %cst_27 : f32 to vector<2x4xf32>
    %55 = arith.mulf %53, %54 : vector<2x4xf32>
    %56 = vector.extract_strided_slice %55 {offsets = [0, 0], sizes = [1, 4], strides = [1, 1]} : vector<2x4xf32> to vector<1x4xf32>
    %57 = vector.extract_strided_slice %55 {offsets = [1, 0], sizes = [1, 4], strides = [1, 1]} : vector<2x4xf32> to vector<1x4xf32>
    %58 = arith.mulf %56, %56 : vector<1x4xf32>
    %59 = arith.subf %57, %58 : vector<1x4xf32>
    %cst_28 = arith.constant 9.99999974E-6 : f32
    %60 = vector.broadcast %cst_28 : f32 to vector<1x4xf32>
    %61 = arith.addf %59, %60 : vector<1x4xf32>
    %62 = math.rsqrt %61 : vector<1x4xf32>
    %63 = arith.mulf %45, %62 : vector<1x4xf32>
    %64 = arith.mulf %56, %63 : vector<1x4xf32>
    %65 = arith.subf %46, %64 : vector<1x4xf32>
    %66 = tpu.concatenate %63, %65 in 0 : vector<1x4xf32>, vector<1x4xf32> -> vector<2x4xf32>
    %cst_29 = arith.constant dense<0.000000e+00> : vector<2x128xf32>
    %67 = tpu.matmul %66, %1, %cst_29 {dimension_numbers = #tpu.dot_dimension_numbers<[1], [0], [0], [1], [0, 0, 1, 1], [], []>} : vector<2x4xf32>, vector<4x128xf32>, vector<2x128xf32> -> vector<2x128xf32>
    %68 = vector.extract_strided_slice %67 {offsets = [0, 0], sizes = [1, 128], strides = [1, 1]} : vector<2x128xf32> to vector<1x128xf32>
    %69 = vector.broadcast %68 : vector<1x128xf32> to vector<16x128xf32>
    %70 = arith.mulf %44, %69 : vector<16x128xf32>
    %71 = vector.extract_strided_slice %67 {offsets = [1, 0], sizes = [1, 128], strides = [1, 1]} : vector<2x128xf32> to vector<1x128xf32>
    %72 = vector.broadcast %71 : vector<1x128xf32> to vector<16x128xf32>
    %73 = arith.addf %70, %72 : vector<16x128xf32>
    %cst_30 = arith.constant 0.000000e+00 : f32
    %74 = vector.broadcast %cst_30 : f32 to vector<16x128xf32>
    %75 = arith.maximumf %73, %74 : vector<16x128xf32>
    %c1_31 = arith.constant 1 : index
    %c0_32 = arith.constant 0 : index
    %c0_33 = arith.constant 0 : index
    %76 = vector.load %arg2[%c1_31, %c0_32, %c0_33] : memref<3x128x128xf32, #tpu.memory_space<vmem>>, vector<1x128x128xf32>
    %77 = vector.shape_cast %76 : vector<1x128x128xf32> to vector<128x128xf32>
    %cst_34 = arith.constant dense<0.000000e+00> : vector<16x128xf32>
    %78 = tpu.matmul %75, %77, %cst_34 {dimension_numbers = #tpu.dot_dimension_numbers<[1], [0], [0], [1], [0, 0, 1, 1], [], []>} : vector<16x128xf32>, vector<128x128xf32>, vector<16x128xf32> -> vector<16x128xf32>
    %c0_35 = arith.constant 0 : index
    %c0_36 = arith.constant 0 : index
    %c0_37 = arith.constant 0 : index
    %79 = vector.load %arg2[%c0_35, %c0_36, %c0_37] : memref<3x128x128xf32, #tpu.memory_space<vmem>>, vector<1x128x128xf32>
    %80 = vector.shape_cast %79 : vector<1x128x128xf32> to vector<128x128xf32>
    %cst_38 = arith.constant dense<0.000000e+00> : vector<16x128xf32>
    %81 = tpu.matmul %75, %80, %cst_38 {dimension_numbers = #tpu.dot_dimension_numbers<[1], [0], [0], [1], [0, 0, 1, 1], [], []>} : vector<16x128xf32>, vector<128x128xf32>, vector<16x128xf32> -> vector<16x128xf32>
    %c2_39 = arith.constant 2 : index
    %c0_40 = arith.constant 0 : index
    %c0_41 = arith.constant 0 : index
    %82 = vector.load %arg2[%c2_39, %c0_40, %c0_41] : memref<3x128x128xf32, #tpu.memory_space<vmem>>, vector<1x128x128xf32>
    %83 = vector.shape_cast %82 : vector<1x128x128xf32> to vector<128x128xf32>
    %cst_42 = arith.constant dense<0.000000e+00> : vector<16x128xf32>
    %84 = tpu.matmul %75, %83, %cst_42 {dimension_numbers = #tpu.dot_dimension_numbers<[1], [0], [0], [1], [0, 0, 1, 1], [], []>} : vector<16x128xf32>, vector<128x128xf32>, vector<16x128xf32> -> vector<16x128xf32>
    %85 = vector.extract_strided_slice %81 {offsets = [15, 0], sizes = [1, 128], strides = [1, 1]} : vector<16x128xf32> to vector<1x128xf32>
    %86 = vector.extract_strided_slice %81 {offsets = [0, 0], sizes = [15, 128], strides = [1, 1]} : vector<16x128xf32> to vector<15x128xf32>
    %87 = tpu.concatenate %85, %86 in 0 : vector<1x128xf32>, vector<15x128xf32> -> vector<16x128xf32>
    %88 = vector.extract_strided_slice %84 {offsets = [1, 0], sizes = [15, 128], strides = [1, 1]} : vector<16x128xf32> to vector<15x128xf32>
    %89 = vector.extract_strided_slice %84 {offsets = [0, 0], sizes = [1, 128], strides = [1, 1]} : vector<16x128xf32> to vector<1x128xf32>
    %90 = tpu.concatenate %88, %89 in 0 : vector<15x128xf32>, vector<1x128xf32> -> vector<16x128xf32>
    %cst_43 = arith.constant 0.000000e+00 : f32
    %91 = vector.broadcast %cst_43 : f32 to vector<16x128xf32>
    %92 = arith.select %20, %87, %91 : vector<16x128xi1>, vector<16x128xf32>
    %93 = arith.addf %78, %92 : vector<16x128xf32>
    %cst_44 = arith.constant 0.000000e+00 : f32
    %94 = vector.broadcast %cst_44 : f32 to vector<16x128xf32>
    %95 = arith.select %22, %90, %94 : vector<16x128xi1>, vector<16x128xf32>
    %96 = arith.addf %93, %95 : vector<16x128xf32>
    %c0_45 = arith.constant 0 : index
    %c0_46 = arith.constant 0 : index
    %97 = vector.load %arg5[%c0_45, %c0_46] : memref<1x4xf32, #tpu.memory_space<vmem>>, vector<1x4xf32>
    %c0_47 = arith.constant 0 : index
    %c0_48 = arith.constant 0 : index
    %98 = vector.load %arg6[%c0_47, %c0_48] : memref<1x4xf32, #tpu.memory_space<vmem>>, vector<1x4xf32>
    %cst_49 = arith.constant dense<0.000000e+00> : vector<128xf32>
    %99 = vector.multi_reduction <add>, %96, %cst_49 [0] : vector<16x128xf32> to vector<128xf32>
    %100 = vector.shape_cast %99 : vector<128xf32> to vector<1x128xf32>
    %101 = arith.mulf %96, %96 : vector<16x128xf32>
    %cst_50 = arith.constant dense<0.000000e+00> : vector<128xf32>
    %102 = vector.multi_reduction <add>, %101, %cst_50 [0] : vector<16x128xf32> to vector<128xf32>
    %103 = vector.shape_cast %102 : vector<128xf32> to vector<1x128xf32>
    %104 = tpu.concatenate %100, %103 in 0 : vector<1x128xf32>, vector<1x128xf32> -> vector<2x128xf32>
    %cst_51 = arith.constant dense<0.000000e+00> : vector<2x4xf32>
    %105 = tpu.matmul %104, %0, %cst_51 {dimension_numbers = #tpu.dot_dimension_numbers<[1], [0], [0], [1], [0, 0, 1, 1], [], []>} : vector<2x128xf32>, vector<128x4xf32>, vector<2x4xf32> -> vector<2x4xf32>
    %cst_52 = arith.constant 0.001953125 : f32
    %106 = vector.broadcast %cst_52 : f32 to vector<2x4xf32>
    %107 = arith.mulf %105, %106 : vector<2x4xf32>
    %108 = vector.extract_strided_slice %107 {offsets = [0, 0], sizes = [1, 4], strides = [1, 1]} : vector<2x4xf32> to vector<1x4xf32>
    %109 = vector.extract_strided_slice %107 {offsets = [1, 0], sizes = [1, 4], strides = [1, 1]} : vector<2x4xf32> to vector<1x4xf32>
    %110 = arith.mulf %108, %108 : vector<1x4xf32>
    %111 = arith.subf %109, %110 : vector<1x4xf32>
    %cst_53 = arith.constant 9.99999974E-6 : f32
    %112 = vector.broadcast %cst_53 : f32 to vector<1x4xf32>
    %113 = arith.addf %111, %112 : vector<1x4xf32>
    %114 = math.rsqrt %113 : vector<1x4xf32>
    %115 = arith.mulf %97, %114 : vector<1x4xf32>
    %116 = arith.mulf %108, %115 : vector<1x4xf32>
    %117 = arith.subf %98, %116 : vector<1x4xf32>
    %118 = tpu.concatenate %115, %117 in 0 : vector<1x4xf32>, vector<1x4xf32> -> vector<2x4xf32>
    %cst_54 = arith.constant dense<0.000000e+00> : vector<2x128xf32>
    %119 = tpu.matmul %118, %1, %cst_54 {dimension_numbers = #tpu.dot_dimension_numbers<[1], [0], [0], [1], [0, 0, 1, 1], [], []>} : vector<2x4xf32>, vector<4x128xf32>, vector<2x128xf32> -> vector<2x128xf32>
    %120 = vector.extract_strided_slice %119 {offsets = [0, 0], sizes = [1, 128], strides = [1, 1]} : vector<2x128xf32> to vector<1x128xf32>
    %121 = vector.broadcast %120 : vector<1x128xf32> to vector<16x128xf32>
    %122 = arith.mulf %96, %121 : vector<16x128xf32>
    %123 = vector.extract_strided_slice %119 {offsets = [1, 0], sizes = [1, 128], strides = [1, 1]} : vector<2x128xf32> to vector<1x128xf32>
    %124 = vector.broadcast %123 : vector<1x128xf32> to vector<16x128xf32>
    %125 = arith.addf %122, %124 : vector<16x128xf32>
    %126 = arith.addf %125, %23 : vector<16x128xf32>
    %cst_55 = arith.constant 0.000000e+00 : f32
    %127 = vector.broadcast %cst_55 : f32 to vector<16x128xf32>
    %128 = arith.maximumf %126, %127 : vector<16x128xf32>
    %c0_56 = arith.constant 0 : index
    %c0_57 = arith.constant 0 : index
    %129 = vector.load %arg9[%c0_56, %c0_57] : memref<16x128xf32, #tpu.memory_space<vmem>>, vector<16x128xf32>
    tpu.vector_store %arg9[%c0_56, %c0_57], %128 {strides = array<i32>} : memref<16x128xf32, #tpu.memory_space<vmem>>, vector<16x128xf32>,
    return
  }
}

</mosaic_0001>

<bundles_post_ra>
// kernel: basic_block_forward.1
= control target key start
LH: loop header
LB: loop body
LE: loop exit
PB: predicated region body
PF: predicated region fallthrough
CT: control target
= control target key end

     0   :  { %vm1870_vm0 = vmmov 0   ;;  %vm286_vm1 = vcmask 1040384   ;;  %vm294_vm2 = vcmask 1046528   ;;  %vm511_vm7 = vcmask 1043456   ;;  %s2443_s1 = inlined_call_operand.vmem [shape: f32[3,128,128], index: 1, kind: input, shape index: {}]   ;;  %s2444_s0 = inlined_call_operand.vmem [shape: f32[16,128], index: 0, kind: input, shape index: {}]   ;;  %s2445_s7 = inlined_call_operand.vmem [shape: f32[128,4], index: 7, kind: input, shape index: {}]   ;;  %s2446_s8 = inlined_call_operand.vmem [shape: f32[4,128], index: 8, kind: input, shape index: {}]   ;;  %s2447_s2 = inlined_call_operand.vmem [shape: f32[3,128,128], index: 2, kind: input, shape index: {}]   ;;  %s2448_s3 = inlined_call_operand.vmem [shape: f32[1,4], index: 3, kind: input, shape index: {}]   ;;  %s2449_s4 = inlined_call_operand.vmem [shape: f32[1,4], index: 4, kind: input, shape index: {}]   ;;  %s2450_s5 = inlined_call_operand.vmem [shape: f32[1,4], index: 5, kind: input, shape index: {}]   ;;  %s2451_s6 = inlined_call_operand.vmem [shape: f32[1,4], index: 6, kind: input, shape index: {}]   ;;  %s2452_s9 = inlined_call_operand.vmem [shape: f32[16,128], index: 9, kind: output, shape index: {}]  }
   0x1   :  { %v99_v0 = vld [vmem:[%s2443_s1] sm:$0xff]  ;;  %v100_v1 = vld [vmem:[%s2443_s1 + $0x8] sm:$0xff]  ;;  %v101_v2 = vld [vmem:[%s2443_s1 + $0x10] sm:$0xff]  ;;  %vm507_vm8 = vcmask 31744  }
   0x2   :  { %v1621_v3 = vpack.c.bf16 %v100_v1, %v99_v0  ;;  %v102_v4 = vld [vmem:[%s2443_s1 + $0x18] sm:$0xff]  ;;  %v103_v6 = vld [vmem:[%s2443_s1 + $0x20] sm:$0xff]  ;;  %v104_v7 = vld [vmem:[%s2443_s1 + $0x28] sm:$0xff] }
   0x3   :  { %v1625_v5 = vpack.c.bf16 %v102_v4, %v101_v2  ;;  %v1629_v8 = vpack.c.bf16 %v104_v7, %v103_v6  ;;  %v1133_v9 = vld [vmem:[%s2443_s1 + $0x100] sm:$0xff]  ;;  %v1134_v10 = vld [vmem:[%s2443_s1 + $0x108] sm:$0xff]  ;;  %v105_v11 = vld [vmem:[%s2443_s1 + $0x30] sm:$0xff] }
   0x4   :  { %1622 = vmatprep.subr.bf16.mxu0 %v1621_v3  ;;  %v106_v12 = vld [vmem:[%s2443_s1 + $0x38] sm:$0xff]  ;;  %v1653_v13 = vpack.c.bf16 %v1134_v10, %v1133_v9  ;;  %v1956_v14 = vld [vmem:[%s2444_s0] sm:$0xff]  ;;  %v1135_v15 = vld [vmem:[%s2443_s1 + $0x110] sm:$0xff]  ;;  %v1869_v10 = vmov 0.0|0.0  }
   0x5   :  { %1624 = vmatpush3.bf16.msra.mxu0 %v1621_v3  ;;  %1363 = vmatprep.mubr.f32.mxu0 %v1956_v14  ;;  %v1136_v16 = vld [vmem:[%s2443_s1 + $0x118] sm:$0xff]  ;;  %v1137_v18 = vld [vmem:[%s2443_s1 + $0x120] sm:$0xff]  ;;  %v1633_v19 = vpack.c.bf16 %v106_v12, %v105_v11  ;;  %v1138_v20 = vld [vmem:[%s2443_s1 + $0x128] sm:$0xff] }
   0x6   :  { %1626 = vmatprep.subr.bf16.mxu0 %v1625_v5  ;;  %1398 = vmatprep.mubr.f32.mxu1 %v1956_v14  ;;  %v1657_v17 = vpack.c.bf16 %v1136_v16, %v1135_v15  ;;  %v107_v21 = vld [vmem:[%s2443_s1 + $0x40] sm:$0xff]  ;;  %v108_v22 = vld [vmem:[%s2443_s1 + $0x48] sm:$0xff]  ;;  %v1661_v23 = vpack.c.bf16 %v1138_v20, %v1137_v18  ;;  %v1139_v24 = vld [vmem:[%s2443_s1 + $0x130] sm:$0xff] }
   0x7   :  { %1654 = vmatprep.subr.bf16.mxu1 %v1653_v13  ;;  %v1140_v25 = vld [vmem:[%s2443_s1 + $0x138] sm:$0xff]  ;;  %v1637_v26 = vpack.c.bf16 %v108_v22, %v107_v21  ;;  %v109_v27 = vld [vmem:[%s2443_s1 + $0x50] sm:$0xff]  ;;  %v1141_v30 = vld [vmem:[%s2443_s1 + $0x140] sm:$0xff] }
   0x8   :  { %1656 = vmatpush3.bf16.msra.mxu1 %v1653_v13  ;;  %v110_v28 = vld [vmem:[%s2443_s1 + $0x58] sm:$0xff]  ;;  %v1665_v29 = vpack.c.bf16 %v1140_v25, %v1139_v24  ;;  %v1142_v31 = vld [vmem:[%s2443_s1 + $0x148] sm:$0xff]  ;;  %v111_v33 = vld [vmem:[%s2443_s1 + $0x60] sm:$0xff] }
   0x9   :  { %1628 = vmatpush3.bf16.msra.mxu0 %v1625_v5  ;;  %1658 = vmatprep.subr.bf16.mxu1 %v1657_v17  ;;  %v1641_v32 = vpack.c.bf16 %v110_v28, %v109_v27  ;;  %v112_v34 = vld [vmem:[%s2443_s1 + $0x68] sm:$0xff]  ;;  %v1669_v35 = vpack.c.bf16 %v1142_v31, %v1141_v30  ;;  %v1143_v36 = vld [vmem:[%s2443_s1 + $0x150] sm:$0xff]  ;;  %v1144_v37 = vld [vmem:[%s2443_s1 + $0x158] sm:$0xff] }
   0xa   :  { %1630 = vmatprep.subr.bf16.mxu0 %v1629_v8  ;;  %v1645_v38 = vpack.c.bf16 %v112_v34, %v111_v33  ;;  %v113_v39 = vld [vmem:[%s2443_s1 + $0x70] sm:$0xff]  ;;  %v114_v40 = vld [vmem:[%s2443_s1 + $0x78] sm:$0xff]  ;;  %v1673_v41 = vpack.c.bf16 %v1144_v37, %v1143_v36  ;;  %v1145_v42 = vld [vmem:[%s2443_s1 + $0x160] sm:$0xff] }
   0xb   :  { %v1146_v43 = vld [vmem:[%s2443_s1 + $0x168] sm:$0xff]  ;;  %v1649_v44 = vpack.c.bf16 %v114_v40, %v113_v39  ;;  %v1117_v45 = vld [vmem:[%s2443_s1 + $0x80] sm:$0xff]  ;;  %v1147_v48 = vld [vmem:[%s2443_s1 + $0x170] sm:$0xff] }
   0xc   :  { %1660 = vmatpush3.bf16.msra.mxu1 %v1657_v17  ;;  %v1118_v46 = vld [vmem:[%s2443_s1 + $0x88] sm:$0xff]  ;;  %v1677_v47 = vpack.c.bf16 %v1146_v43, %v1145_v42  ;;  %v1148_v49 = vld [vmem:[%s2443_s1 + $0x178] sm:$0xff]  ;;  %v1119_v51 = vld [vmem:[%s2443_s1 + $0x90] sm:$0xff] }
   0xd   :  { %1632 = vmatpush3.bf16.msra.mxu0 %v1629_v8  ;;  %1662 = vmatprep.subr.bf16.mxu1 %v1661_v23  ;;  %v1685_v50 = vpack.c.bf16 %v1118_v46, %v1117_v45  ;;  %v1120_v52 = vld [vmem:[%s2443_s1 + $0x98] sm:$0xff]  ;;  %v1681_v53 = vpack.c.bf16 %v1148_v49, %v1147_v48  ;;  %v2041_v54 = vld [vmem:[%s2444_s0 + $0x8] sm:$0xff]  ;;  %v1121_v56 = vld [vmem:[%s2443_s1 + $0xa0] sm:$0xff]  ;;  %v49_v49 = vlaneseq }
   0xe   :  { %1634 = vmatprep.subr.bf16.mxu0 %v1633_v19  ;;  %v1689_v55 = vpack.c.bf16 %v1120_v52, %v1119_v51  ;;  %v1122_v57 = vld [vmem:[%s2443_s1 + $0xa8] sm:$0xff]  ;;  %v1123_v59 = vld [vmem:[%s2443_s1 + $0xb0] sm:$0xff]  ;;  %v1124_v60 = vld [vmem:[%s2443_s1 + $0xb8] sm:$0xff] }
   0xf   :  { %v1693_v58 = vpack.c.bf16 %v1122_v57, %v1121_v56  ;;  %v1697_v61 = vpack.c.bf16 %v1124_v60, %v1123_v59  ;;  %v1125_v62 = vld [vmem:[%s2443_s1 + $0xc0] sm:$0xff]  ;;  %v1126_v63 = vld [vmem:[%s2443_s1 + $0xc8] sm:$0xff]  ;;  %v1127_v1 = vld [vmem:[%s2443_s1 + $0xd0] sm:$0xff] }
  0x10   :  { %1664 = vmatpush3.bf16.msra.mxu1 %v1661_v23  ;;  %v1701_v0 = vpack.c.bf16 %v1126_v63, %v1125_v62  ;;  %v1128_v2 = vld [vmem:[%s2443_s1 + $0xd8] sm:$0xff]  ;;  %v1129_v4 = vld [vmem:[%s2443_s1 + $0xe0] sm:$0xff]  ;;  %v1130_v5 = vld [vmem:[%s2443_s1 + $0xe8] sm:$0xff] }
  0x11   :  { %1636 = vmatpush3.bf16.msra.mxu0 %v1633_v19  ;;  %1666 = vmatprep.subr.bf16.mxu1 %v1665_v29  ;;  %v1705_v3 = vpack.c.bf16 %v1128_v2, %v1127_v1  ;;  %v1709_v6 = vpack.c.bf16 %v1130_v5, %v1129_v4  ;;  %v1131_v7 = vld [vmem:[%s2443_s1 + $0xf0] sm:$0xff]  ;;  %v1132_v8 = vld [vmem:[%s2443_s1 + $0xf8] sm:$0xff]  ;;  %v32_v11 = vld [vmem:[%s2445_s7] sm:$0xff] }
  0x12   :  { %1638 = vmatprep.subr.bf16.mxu0 %v1637_v26  ;;  %v1713_v9 = vpack.c.bf16 %v1132_v8, %v1131_v7  ;;  %v33_v12 = vld [vmem:[%s2445_s7 + $0x8] sm:$0xff]  ;;  %v34_v13 = vld [vmem:[%s2445_s7 + $0x10] sm:$0xff]  ;;  %v35_v16 = vld [vmem:[%s2445_s7 + $0x18] sm:$0xff] }
  0x13   :  { %v2093_v15 = vpack.c.bf16 %v33_v12, %v32_v11  ;;  %v2099_v17 = vpack.c.bf16 %v35_v16, %v34_v13  ;;  %v36_v18 = vld [vmem:[%s2445_s7 + $0x20] sm:$0xff]  ;;  %v37_v19 = vld [vmem:[%s2445_s7 + $0x28] sm:$0xff]  ;;  %v38_v21 = vld [vmem:[%s2445_s7 + $0x30] sm:$0xff] }
  0x14   :  { %1668 = vmatpush3.bf16.msra.mxu1 %v1665_v29  ;;  %v2110_v20 = vpack.c.bf16 %v37_v19, %v36_v18  ;;  %v39_v22 = vld [vmem:[%s2445_s7 + $0x38] sm:$0xff]  ;;  %v40_v24 = vld [vmem:[%s2445_s7 + $0x40] sm:$0xff]  ;;  %v41_v25 = vld [vmem:[%s2445_s7 + $0x48] sm:$0xff] }
  0x15   :  { %1640 = vmatpush3.bf16.msra.mxu0 %v1637_v26  ;;  %1670 = vmatprep.subr.bf16.mxu1 %v1669_v35  ;;  %v2120_v23 = vpack.c.bf16 %v39_v22, %v38_v21  ;;  %v2130_v26 = vpack.c.bf16 %v41_v25, %v40_v24  ;;  %v42_v27 = vld [vmem:[%s2445_s7 + $0x50] sm:$0xff]  ;;  %v43_v28 = vld [vmem:[%s2445_s7 + $0x58] sm:$0xff]  ;;  %v44_v30 = vld [vmem:[%s2445_s7 + $0x60] sm:$0xff] }
  0x16   :  { %1642 = vmatprep.subr.bf16.mxu0 %v1641_v32  ;;  %v2140_v29 = vpack.c.bf16 %v43_v28, %v42_v27  ;;  %v45_v31 = vld [vmem:[%s2445_s7 + $0x68] sm:$0xff]  ;;  %v46_v33 = vld [vmem:[%s2445_s7 + $0x70] sm:$0xff]  ;;  %v47_v34 = vld [vmem:[%s2445_s7 + $0x78] sm:$0xff] }
  0x17   :  { %v2164_v36 = vpack.c.bf16 %v47_v34, %v46_v33  ;;  %v617_v33 = vld [vmem:[%s2447_s2 + $0x8] sm:$0xff]  ;;  %v1167_v34 = vld [vmem:[%s2447_s2 + $0x100] sm:$0xff] }
  0x18   :  { %1672 = vmatpush3.bf16.msra.mxu1 %v1669_v35  ;;  %v1871_v35 = vmov 0.0  }
  0x19   :  { %1644 = vmatpush3.bf16.msra.mxu0 %v1641_v32  ;;  %1674 = vmatprep.subr.bf16.mxu1 %v1673_v41  ;;  %v2150_v32 = vpack.c.bf16 %v45_v31, %v44_v30  ;;  %v2214_v30 = vld [vmem:[%s2446_s8] sm:$0xf] }
  0x1a   :  { %1646 = vmatprep.subr.bf16.mxu0 %v1645_v38  ;;  %v616_v31 = vld [vmem:[%s2447_s2] sm:$0xff] }
  0x1c   :  { %1676 = vmatpush3.bf16.msra.mxu1 %v1673_v41 }
  0x1d   :  { %1648 = vmatpush3.bf16.msra.mxu0 %v1645_v38  ;;  %1678 = vmatprep.subr.bf16.mxu1 %v1677_v47 }
  0x1e   :  { %1650 = vmatprep.subr.bf16.mxu0 %v1649_v44 }
  0x20   :  { %1680 = vmatpush3.bf16.msra.mxu1 %v1677_v47 }
  0x21   :  { %1652 = vmatpush3.bf16.msra.mxu0 %v1649_v44  ;;  %1682 = vmatprep.subr.bf16.mxu1 %v1681_v53 }
  0x22   :  { %1686 = vmatprep.subr.bf16.mxu0 %v1685_v50 }
  0x24   :  { %1364 = vmatmul.mubr.f32.vlgmr.msra.gmra.mrb[0].mxu0 %v2041_v54  ;;  %1684 = vmatpush3.bf16.msra.mxu1 %v1681_v53 }
  0x25   :  { %1688 = vmatpush3.bf16.msra.mxu0 %v1685_v50  ;;  %1433 = vmatprep.mubr.f32.mxu0 %v1956_v14  ;;  %v2172_v50 = vshrl.u32 %v49_v49, 7  ;;  %v624_v49 = vld [vmem:[%s2447_s2 + $0x40] sm:$0xff] }
  0x26   :  { %1690 = vmatprep.subr.bf16.mxu0 %v1689_v55  ;;  %1717 = vmatprep.subr.bf16.mxu1 %v1869_v10 }
  0x27   :  { %1399 = vmatmul.mubr.f32.vlgmr.msra.gmra.mrb[0].mxu1 %v2041_v54  ;;  %v51_v51 = vadd.s32 8, %v2172_v50  ;;  %v56_v53 = vand.u32 7, %v2172_v50 }
  0x28   :  { %1719 = vmatpush3.bf16.msra.mxu1 %v2093_v15  ;;  %1468 = vmatprep.mubr.msk.f32.mxu1 %vm1870_vm0, %v1871_v35 }
  0x29   :  { %1692 = vmatpush3.bf16.msra.mxu0 %v1689_v55  ;;  %1720 = vmatprep.subr.bf16.mxu1 %v1869_v10  ;;  %v63_v52 = vand.u32 7, %v51_v51  ;;  %vm2184_vm5 = vcmp.ne.s32.totalorder %v56_v53, 0  ;;  %vm2188_vm6 = vcmp.ne.s32.totalorder %v56_v53, 7  ;;  %v625_v51 = vld [vmem:[%s2447_s2 + $0x48] sm:$0xff]  ;;  %v626_v53 = vld [vmem:[%s2447_s2 + $0x50] sm:$0xff] }
  0x2a   :  { %1694 = vmatprep.subr.bf16.mxu0 %v1693_v58 }
  0x2b   :  { %vm2176_vm3 = vcmp.ne.s32.totalorder %v63_v52, 0  ;;  %vm2180_vm4 = vcmp.ne.s32.totalorder %v63_v52, 7  ;;  %v1757_v52 = vpack.c.bf16 %v625_v51, %v624_v49  ;;  %v628_v49 = vld [vmem:[%s2447_s2 + $0x60] sm:$0xff]  ;;  %v629_v51 = vld [vmem:[%s2447_s2 + $0x68] sm:$0xff] }
  0x2c   :  { %1722 = vmatpush3.bf16.msra.mxu1 %v2099_v17 }
  0x2d   :  { %1696 = vmatpush3.bf16.msra.mxu0 %v1693_v58  ;;  %1723 = vmatprep.subr.bf16.mxu1 %v1869_v10 }
  0x2e   :  { %1698 = vmatprep.subr.bf16.mxu0 %v1697_v61 }
  0x30   :  { %1725 = vmatpush3.bf16.msra.mxu1 %v2110_v20 }
  0x31   :  { %1700 = vmatpush3.bf16.msra.mxu0 %v1697_v61  ;;  %1726 = vmatprep.subr.bf16.mxu1 %v1869_v10 }
  0x32   :  { %1702 = vmatprep.subr.bf16.mxu0 %v1701_v0 }
  0x34   :  { %1728 = vmatpush3.bf16.msra.mxu1 %v2120_v23 }
  0x35   :  { %1704 = vmatpush3.bf16.msra.mxu0 %v1701_v0  ;;  %1729 = vmatprep.subr.bf16.mxu1 %v1869_v10 }
  0x36   :  { %1706 = vmatprep.subr.bf16.mxu0 %v1705_v3 }
  0x38   :  { %1731 = vmatpush3.bf16.msra.mxu1 %v2130_v26 }
  0x39   :  { %1708 = vmatpush3.bf16.msra.mxu0 %v1705_v3  ;;  %1732 = vmatprep.subr.bf16.mxu1 %v1869_v10 }
  0x3a   :  { %1710 = vmatprep.subr.bf16.mxu0 %v1709_v6 }
  0x3c   :  { %1734 = vmatpush3.bf16.msra.mxu1 %v2140_v29 }
  0x3d   :  { %1712 = vmatpush3.bf16.msra.mxu0 %v1709_v6  ;;  %1735 = vmatprep.subr.bf16.mxu1 %v1869_v10 }
  0x3e   :  { %1714 = vmatprep.subr.bf16.mxu0 %v1713_v9 }
  0x40   :  { %1737 = vmatpush3.bf16.msra.mxu1 %v2150_v32 }
  0x41   :  { %1716 = vmatpush3.bf16.msra.mxu0 %v1713_v9  ;;  %1738 = vmatprep.subr.bf16.mxu1 %v1869_v10 }
  0x42   :  { %1471 = vmatprep.subr.mxu0 %v1871_v35 }
  0x44   :  { %1434 = vmatmul.mubr.f32.vlgmr.msra.gmra.mrb[2].mxu0 %v2041_v54  ;;  %1740 = vmatpush3.bf16.msra.mxu1 %v2164_v36 }
  0x45   :  { %1473 = vmatprep.mubr.msk.f32.mxu0 %vm1870_vm0, %v1871_v35  ;;  %1472 = vmatpush3.msk.msra.mxu0 %vm511_vm7, %v2214_v30 }
  0xf7   :  { %v1365_v37 = vpop.f32.mrb[0].mxu0 }
  0xf8   :  { %v283_v38 = vrot.slane %v1365_v37, 7  ;;  %v181_v39 = vpop.f32.mrb[1].mxu0  ;;  %v1741_v37 = vpack.c.bf16 %v617_v33, %v616_v31 }
  0xf9   :  { %v287_v40 = vrot.slane %v181_v39, 7  ;;  %v618_v39 = vld [vmem:[%s2447_s2 + $0x10] sm:$0xff] }
  0xfa   :  { %v1400_v43 = vpop.f32.mrb[0].mxu1  ;;  %1742 = vmatprep.subr.bf16.mxu1 %v1741_v37 }
  0xfb   :  { %v288_v41 = vsel %vm286_vm1, %v287_v40, %v283_v38  ;;  %v291_v42 = vsel %vm286_vm1, %v283_v38, %v287_v40  ;;  %v296_v44 = vrot.slane %v1400_v43, 1  ;;  %v273_v45 = vpop.f32.mrb[1].mxu1  ;;  %v1168_v38 = vld [vmem:[%s2447_s2 + $0x108] sm:$0xff]  ;;  %v619_v40 = vld [vmem:[%s2447_s2 + $0x18] sm:$0xff]  ;;  %v620_v43 = vld [vmem:[%s2447_s2 + $0x20] sm:$0xff] }
  0xfc   :  { %v295_v46 = vrot.slane %v273_v45, 1  ;;  %v303_v59 = vsel %vm2176_vm3, %v288_v41, 0.0  ;;  %v302_v63 = vsel %vm2184_vm5, %v291_v42, 0.0  ;;  %v1773_v41 = vpack.c.bf16 %v1168_v38, %v1167_v34  ;;  %v1172_v38 = vld [vmem:[%s2447_s2 + $0x128] sm:$0xff] }
  0xfd   :  { %v1745_v42 = vpack.c.bf16 %v619_v40, %v618_v39  ;;  %v1173_v40 = vld [vmem:[%s2447_s2 + $0x130] sm:$0xff] }
  0xfe   :  { %v301_v47 = vsel %vm294_vm2, %v296_v44, %v295_v46  ;;  %v297_v48 = vsel %vm294_vm2, %v295_v46, %v296_v44  ;;  %1774 = vmatprep.subr.bf16.mxu0 %v1773_v41  ;;  %v621_v44 = vld [vmem:[%s2447_s2 + $0x28] sm:$0xff]  ;;  %v622_v46 = vld [vmem:[%s2447_s2 + $0x30] sm:$0xff] }
  0xff   :  { %v380_v61 = vsel %vm2180_vm4, %v301_v47, 0.0  ;;  %v379_v1 = vsel %vm2188_vm6, %v297_v48, 0.0  ;;  %v1749_v45 = vpack.c.bf16 %v621_v44, %v620_v43  ;;  %v623_v47 = vld [vmem:[%s2447_s2 + $0x38] sm:$0xff]  ;;  %v1175_v44 = vld [vmem:[%s2447_s2 + $0x140] sm:$0xff] }
 0x100   :  { %v1753_v48 = vpack.c.bf16 %v623_v47, %v622_v46  ;;  %v1177_v46 = vld [vmem:[%s2447_s2 + $0x150] sm:$0xff]  ;;  %v1178_v47 = vld [vmem:[%s2447_s2 + $0x158] sm:$0xff] }
 0x117   :  { %v1435_v60 = vpop.f32.mrb[2].mxu0 }
 0x118   :  { %v376_v62 = vadd.f32 %v1435_v60, %v303_v59  ;;  %v370_v0 = vpop.f32.mrb[3].mxu0  ;;  %v627_v59 = vld [vmem:[%s2447_s2 + $0x58] sm:$0xff] }
 0x119   :  { %v371_v2 = vadd.f32 %v370_v0, %v302_v63  ;;  %v1761_v60 = vpack.c.bf16 %v627_v59, %v626_v53  ;;  %v1179_v53 = vld [vmem:[%s2447_s2 + $0x160] sm:$0xff]  ;;  %v1180_v59 = vld [vmem:[%s2447_s2 + $0x168] sm:$0xff] }
 0x11a   :  { %v2200_v3 = vadd.f32 %v380_v61, %v376_v62 }
 0x11b   :  { %v2202_v4 = vadd.f32 %v379_v1, %v371_v2 }
 0x11c   :  { %v393_v5 = vmul.f32 %v2200_v3, %v2200_v3 }
 0x11d   :  { %v385_v6 = vadd.f32 %v2200_v3, %v2202_v4  ;;  %v392_v7 = vmul.f32 %v2202_v4, %v2202_v4 }
 0x11f   :  { %v386_v8 = vrot.slane %v385_v6, 4  ;;  %v394_v9 = vadd.f32 %v393_v5, %v392_v7 }
 0x121   :  { %v387_v11 = vadd.f32 %v386_v8, %v385_v6  ;;  %v395_v12 = vrot.slane %v394_v9, 4  ;;  %v1872_v6 = vmov 1966171168  }
 0x122   :  { %v482_v7 = vunpack.c.l.s4 %v1872_v6  ;;  %v1152_v6 = vld [vmem:[%s2447_s2 + $0x88] sm:$0xff] }
 0x123   :  { %v388_v13 = vrot.slane %v387_v11, 2  ;;  %v396_v16 = vadd.f32 %v395_v12, %v394_v9 }
 0x124   :  { %v483_v8 = vunpack.c.0.s8 %v482_v7 }
 0x125   :  { %v389_v18 = vadd.f32 %v388_v13, %v387_v11  ;;  %v397_v19 = vrot.slane %v396_v16, 2 }
 0x126   :  { %v2261_v9 = vsub.s32 %v483_v8, %v2172_v50  ;;  %v593_v8 = vsub.s32 1, %v2172_v50 }
 0x127   :  { %v390_v21 = vrot.slane %v389_v18, 1  ;;  %v398_v22 = vadd.f32 %v397_v19, %v396_v16  ;;  %v383_v16 = vld [vmem:[%s2448_s3] sm:$0x1] }
 0x129   :  { %v399_v24 = vrot.slane %v398_v22, 1  ;;  %v391_v25 = vadd.f32 %v390_v21, %v389_v18  ;;  %v384_v21 = vld [vmem:[%s2449_s4] sm:$0x1] }
 0x12b   :  { %v400_v27 = vadd.f32 %v399_v24, %v398_v22  ;;  %v2272_v24 = vsub.s32 0, %v2172_v50 }
 0x12d   :  { %v401_v28 = vsel %vm286_vm1, %v391_v25, %v400_v27  ;;  %v1169_v27 = vld [vmem:[%s2447_s2 + $0x110] sm:$0xff] }
 0x12e   :  { %1469 = vmatmul.mubr.f32.vlgmr.msra.gmra.mrb[2].mxu1 %v401_v28  ;;  %v1170_v28 = vld [vmem:[%s2447_s2 + $0x118] sm:$0xff] }
 0x12f   :  { %1744 = vmatpush3.bf16.msra.mxu1 %v1741_v37  ;;  %v1777_v33 = vpack.c.bf16 %v1170_v28, %v1169_v27  ;;  %v1171_v37 = vld [vmem:[%s2447_s2 + $0x120] sm:$0xff]  ;;  %v1154_v27 = vld [vmem:[%s2447_s2 + $0x98] sm:$0xff] }
 0x130   :  { %1746 = vmatprep.subr.bf16.mxu1 %v1745_v42  ;;  %v1781_v39 = vpack.c.bf16 %v1172_v38, %v1171_v37  ;;  %v1157_v37 = vld [vmem:[%s2447_s2 + $0xb0] sm:$0xff]  ;;  %v1158_v38 = vld [vmem:[%s2447_s2 + $0xb8] sm:$0xff] }
 0x133   :  { %1748 = vmatpush3.bf16.msra.mxu1 %v1745_v42  ;;  %v1174_v42 = vld [vmem:[%s2447_s2 + $0x138] sm:$0xff] }
 0x134   :  { %1750 = vmatprep.subr.bf16.mxu1 %v1749_v45  ;;  %v1785_v43 = vpack.c.bf16 %v1174_v42, %v1173_v40  ;;  %v1160_v40 = vld [vmem:[%s2447_s2 + $0xc8] sm:$0xff] }
 0x137   :  { %1752 = vmatpush3.bf16.msra.mxu1 %v1749_v45 }
 0x138   :  { %1754 = vmatprep.subr.bf16.mxu1 %v1753_v48 }
 0x13b   :  { %1756 = vmatpush3.bf16.msra.mxu1 %v1753_v48  ;;  %v1793_v48 = vpack.c.bf16 %v1178_v47, %v1177_v46  ;;  %v1165_v46 = vld [vmem:[%s2447_s2 + $0xf0] sm:$0xff] }
 0x13c   :  { %1758 = vmatprep.subr.bf16.mxu1 %v1757_v52 }
 0x13f   :  { %1760 = vmatpush3.bf16.msra.mxu1 %v1757_v52  ;;  %v1765_v52 = vpack.c.bf16 %v629_v51, %v628_v49 }
 0x140   :  { %1762 = vmatprep.subr.bf16.mxu1 %v1761_v60 }
 0x143   :  { %1764 = vmatpush3.bf16.msra.mxu1 %v1761_v60  ;;  %v1797_v60 = vpack.c.bf16 %v1180_v59, %v1179_v53 }
 0x144   :  { %1766 = vmatprep.subr.bf16.mxu1 %v1765_v52 }
 0x147   :  { %1768 = vmatpush3.bf16.msra.mxu1 %v1765_v52 }
 0x201   :  { %v468_v61 = vpop.f32.mrb[2].mxu1 }
 0x202   :  { %v472_v62 = vmul.f32 0.001953125, %v468_v61  ;;  %v1470_v63 = vpop.f32.mrb[3].mxu1  ;;  %v630_v61 = vld [vmem:[%s2447_s2 + $0x70] sm:$0xff] }
 0x204   :  { %v473_v0 = vmul.f32 %v472_v62, %v472_v62 }
 0x206   :  { %v475_v1 = vrot.slane %v473_v0, 7  ;;  %v1181_v0 = vld [vmem:[%s2447_s2 + $0x170] sm:$0xff] }
 0x208   :  { %v477_v2 = vsub.f32 %v472_v62, %v475_v1  ;;  %v1182_v1 = vld [vmem:[%s2447_s2 + $0x178] sm:$0xff] }
 0x20a   :  { %v478_v5 = vadd.f32 1e-05, %v477_v2  ;;  %v1801_v2 = vpack.c.bf16 %v1182_v1, %v1181_v0 }
 0x20c   :  { %1865 = vrsqrt.f32 %v478_v5  ;;  %v1151_v5 = vld [vmem:[%s2447_s2 + $0x80] sm:$0xff] }
 0x20d   :  { %v1805_v7 = vpack.c.bf16 %v1152_v6, %v1151_v5 }
 0x216   :  { %v1866_v11 = vpop.eup %1865 }
 0x217   :  { %v487_v12 = vrot.slane %v1866_v11, %v2261_v9 }
 0x219   :  { %v488_v13 = vcombine.high %v487_v12, %v487_v12 }
 0x21b   :  { %v495_v18 = vrot.slane %v488_v13, %v2261_v9 }
 0x21d   :  { %v497_v19 = vmul.f32 %v495_v18, %v383_v16 }
 0x21f   :  { %v498_v22 = vmul.f32 %v497_v19, %v472_v62  ;;  %v631_v62 = vld [vmem:[%s2447_s2 + $0x78] sm:$0xff] }
 0x220   :  { %v1769_v63 = vpack.c.bf16 %v631_v62, %v630_v61 }
 0x221   :  { %v499_v25 = vsub.f32 %v384_v21, %v498_v22 }
 0x222   :  { %1770 = vmatprep.subr.bf16.mxu1 %v1769_v63 }
 0x223   :  { %v504_v31 = vrot.slane %v499_v25, %v2272_v24  ;;  %1772 = vmatpush3.bf16.msra.mxu1 %v1769_v63  ;;  %v1153_v25 = vld [vmem:[%s2447_s2 + $0x90] sm:$0xff] }
 0x224   :  { %1806 = vmatprep.subr.bf16.mxu1 %v1805_v7 }
 0x225   :  { %v506_v34 = vsel %vm286_vm1, %v497_v19, %v504_v31 }
 0x226   :  { %1474 = vmatmul.mubr.msk.f32.vlgmr.msra.gmra.mrb[4].mxu0 %vm507_vm8, %v506_v34 }
 0x227   :  { %1776 = vmatpush3.bf16.msra.mxu0 %v1773_v41  ;;  %v1176_v41 = vld [vmem:[%s2447_s2 + $0x148] sm:$0xff] }
 0x228   :  { %1778 = vmatprep.subr.bf16.mxu0 %v1777_v33  ;;  %v1789_v45 = vpack.c.bf16 %v1176_v41, %v1175_v44  ;;  %v1163_v41 = vld [vmem:[%s2447_s2 + $0xe0] sm:$0xff] }
 0x22b   :  { %1780 = vmatpush3.bf16.msra.mxu0 %v1777_v33  ;;  %v1809_v33 = vpack.c.bf16 %v1154_v27, %v1153_v25 }
 0x22c   :  { %1782 = vmatprep.subr.bf16.mxu0 %v1781_v39 }
 0x22f   :  { %1784 = vmatpush3.bf16.msra.mxu0 %v1781_v39  ;;  %v1817_v39 = vpack.c.bf16 %v1158_v38, %v1157_v37 }
 0x230   :  { %1786 = vmatprep.subr.bf16.mxu0 %v1785_v43 }
 0x233   :  { %1788 = vmatpush3.bf16.msra.mxu0 %v1785_v43  ;;  %v1161_v43 = vld [vmem:[%s2447_s2 + $0xd0] sm:$0xff] }
 0x234   :  { %1790 = vmatprep.subr.bf16.mxu0 %v1789_v45 }
 0x237   :  { %1792 = vmatpush3.bf16.msra.mxu0 %v1789_v45 }
 0x238   :  { %1794 = vmatprep.subr.bf16.mxu0 %v1793_v48 }
 0x23b   :  { %1796 = vmatpush3.bf16.msra.mxu0 %v1793_v48 }
 0x23c   :  { %1798 = vmatprep.subr.bf16.mxu0 %v1797_v60 }
 0x23f   :  { %1800 = vmatpush3.bf16.msra.mxu0 %v1797_v60 }
 0x240   :  { %1802 = vmatprep.subr.bf16.mxu0 %v1801_v2 }
 0x243   :  { %1804 = vmatpush3.bf16.msra.mxu0 %v1801_v2 }
 0x244   :  { %1837 = vmatprep.subr.bf16.mxu0 %v1869_v10 }
 0x2f9   :  { %v581_v11 = vpop.f32.mrb[4].mxu0 }
 0x2fa   :  { %v588_v12 = vrot.slane %v581_v11, %v2272_v24  ;;  %v1475_v13 = vpop.f32.mrb[5].mxu0  ;;  %v594_v19 = vrot.slane %v581_v11, %v593_v8 }
 0x2fc   :  { %v589_v16 = vmul.f32 %v588_v12, %v2202_v4  ;;  %v590_v18 = vmul.f32 %v588_v12, %v2200_v3  ;;  %v1155_v3 = vld [vmem:[%s2447_s2 + $0xa0] sm:$0xff]  ;;  %v1156_v4 = vld [vmem:[%s2447_s2 + $0xa8] sm:$0xff] }
 0x2fd   :  { %v1813_v34 = vpack.c.bf16 %v1156_v4, %v1155_v3 }
 0x2fe   :  { %v595_v21 = vadd.f32 %v594_v19, %v589_v16  ;;  %v596_v22 = vadd.f32 %v594_v19, %v590_v18 }
 0x300   :  { %v598_v28 = vmax.f32 %v596_v22, 0.0  ;;  %v597_v31 = vmax.f32 %v595_v21, 0.0 }
 0x302   :  { %1508 = vmatprep.mubr.f32.mxu1 %v597_v31  ;;  %1543 = vmatprep.mubr.f32.mxu0 %v597_v31 }
 0x303   :  { %1509 = vmatmul.mubr.f32.vlgmr.msra.gmra.mrb[4].mxu1 %v598_v28  ;;  %1544 = vmatmul.mubr.f32.vlgmr.msra.gmra.mrb[6].mxu0 %v598_v28 }
 0x304   :  { %1808 = vmatpush3.bf16.msra.mxu1 %v1805_v7  ;;  %1578 = vmatprep.mubr.f32.mxu1 %v597_v31 }
 0x305   :  { %1810 = vmatprep.subr.bf16.mxu1 %v1809_v33  ;;  %1839 = vmatpush3.bf16.msra.mxu0 %v2093_v15  ;;  %v1159_v15 = vld [vmem:[%s2447_s2 + $0xc0] sm:$0xff] }
 0x306   :  { %1840 = vmatprep.subr.bf16.mxu0 %v1869_v10  ;;  %1613 = vmatprep.mubr.msk.f32.mxu0 %vm1870_vm0, %v1871_v35  ;;  %v1821_v42 = vpack.c.bf16 %v1160_v40, %v1159_v15 }
 0x308   :  { %1812 = vmatpush3.bf16.msra.mxu1 %v1809_v33 }
 0x309   :  { %1814 = vmatprep.subr.bf16.mxu1 %v1813_v34  ;;  %1842 = vmatpush3.bf16.msra.mxu0 %v2099_v17  ;;  %v1162_v17 = vld [vmem:[%s2447_s2 + $0xd8] sm:$0xff] }
 0x30a   :  { %1843 = vmatprep.subr.bf16.mxu0 %v1869_v10  ;;  %v1825_v44 = vpack.c.bf16 %v1162_v17, %v1161_v43  ;;  %v898_v43 = vld [vmem:[%s2450_s5] sm:$0x1] }
 0x30c   :  { %1816 = vmatpush3.bf16.msra.mxu1 %v1813_v34 }
 0x30d   :  { %1818 = vmatprep.subr.bf16.mxu1 %v1817_v39  ;;  %1845 = vmatpush3.bf16.msra.mxu0 %v2110_v20  ;;  %v1164_v20 = vld [vmem:[%s2447_s2 + $0xe8] sm:$0xff] }
 0x30e   :  { %1846 = vmatprep.subr.bf16.mxu0 %v1869_v10  ;;  %v1829_v45 = vpack.c.bf16 %v1164_v20, %v1163_v41  ;;  %v899_v41 = vld [vmem:[%s2451_s6] sm:$0x1] }
 0x310   :  { %1820 = vmatpush3.bf16.msra.mxu1 %v1817_v39 }
 0x311   :  { %1822 = vmatprep.subr.bf16.mxu1 %v1821_v42  ;;  %1848 = vmatpush3.bf16.msra.mxu0 %v2120_v23  ;;  %v1166_v23 = vld [vmem:[%s2447_s2 + $0xf8] sm:$0xff] }
 0x312   :  { %1849 = vmatprep.subr.bf16.mxu0 %v1869_v10  ;;  %v1833_v47 = vpack.c.bf16 %v1166_v23, %v1165_v46 }
 0x314   :  { %1824 = vmatpush3.bf16.msra.mxu1 %v1821_v42 }
 0x315   :  { %1826 = vmatprep.subr.bf16.mxu1 %v1825_v44  ;;  %1851 = vmatpush3.bf16.msra.mxu0 %v2130_v26 }
 0x316   :  { %1852 = vmatprep.subr.bf16.mxu0 %v1869_v10 }
 0x318   :  { %1828 = vmatpush3.bf16.msra.mxu1 %v1825_v44 }
 0x319   :  { %1830 = vmatprep.subr.bf16.mxu1 %v1829_v45  ;;  %1854 = vmatpush3.bf16.msra.mxu0 %v2140_v29 }
 0x31a   :  { %1855 = vmatprep.subr.bf16.mxu0 %v1869_v10 }
 0x31c   :  { %1832 = vmatpush3.bf16.msra.mxu1 %v1829_v45 }
 0x31d   :  { %1834 = vmatprep.subr.bf16.mxu1 %v1833_v47  ;;  %1857 = vmatpush3.bf16.msra.mxu0 %v2150_v32 }
 0x31e   :  { %1858 = vmatprep.subr.bf16.mxu0 %v1869_v10 }
 0x320   :  { %1836 = vmatpush3.bf16.msra.mxu1 %v1833_v47 }
 0x321   :  { %1860 = vmatpush3.bf16.msra.mxu0 %v2164_v36  ;;  %1616 = vmatprep.subr.mxu1 %v1871_v35 }
 0x323   :  { %1579 = vmatmul.mubr.f32.vlgmr.msra.gmra.mrb[6].mxu1 %v598_v28 }
 0x324   :  { %1617 = vmatpush3.msk.msra.mxu1 %vm511_vm7, %v2214_v30  ;;  %1618 = vmatprep.mubr.msk.f32.mxu1 %vm1870_vm0, %v1871_v35 }
 0x3d6   :  { %v1510_v26 = vpop.f32.mrb[4].mxu1  ;;  %v1545_v29 = vpop.f32.mrb[6].mxu0 }
 0x3d7   :  { %v800_v48 = vrot.slane %v1510_v26, 7  ;;  %v811_v49 = vrot.slane %v1545_v29, 1  ;;  %v698_v51 = vpop.f32.mrb[5].mxu1  ;;  %v790_v32 = vpop.f32.mrb[7].mxu0 }
 0x3d8   :  { %v803_v52 = vrot.slane %v698_v51, 7  ;;  %v810_v10 = vrot.slane %v790_v32, 1 }
 0x3da   :  { %v804_v53 = vsel %vm286_vm1, %v803_v52, %v800_v48  ;;  %v816_v36 = vsel %vm294_vm2, %v811_v49, %v810_v10  ;;  %v807_v59 = vsel %vm286_vm1, %v800_v48, %v803_v52  ;;  %v812_v60 = vsel %vm294_vm2, %v810_v10, %v811_v49 }
 0x3db   :  { %v818_v30 = vsel %vm2176_vm3, %v804_v53, 0.0  ;;  %v817_v62 = vsel %vm2184_vm5, %v807_v59, 0.0  ;;  %v895_v0 = vsel %vm2180_vm4, %v816_v36, 0.0  ;;  %v894_v5 = vsel %vm2188_vm6, %v812_v60, 0.0 }
 0x3f6   :  { %v1580_v35 = vpop.f32.mrb[6].mxu1 }
 0x3f7   :  { %v891_v61 = vadd.f32 %v1580_v35, %v818_v30  ;;  %v885_v63 = vpop.f32.mrb[7].mxu1 }
 0x3f8   :  { %v886_v1 = vadd.f32 %v885_v63, %v817_v62 }
 0x3f9   :  { %v897_v2 = vadd.f32 %v895_v0, %v891_v61 }
 0x3fa   :  { %v896_v6 = vadd.f32 %v894_v5, %v886_v1 }
 0x3fb   :  { %v908_v7 = vmul.f32 %v897_v2, %v897_v2 }
 0x3fc   :  { %v900_v11 = vadd.f32 %v897_v2, %v896_v6  ;;  %v907_v12 = vmul.f32 %v896_v6, %v896_v6 }
 0x3fe   :  { %v901_v55 = vrot.slane %v900_v11, 4  ;;  %v909_v13 = vadd.f32 %v908_v7, %v907_v12 }
 0x400   :  { %v902_v16 = vadd.f32 %v901_v55, %v900_v11  ;;  %v910_v18 = vrot.slane %v909_v13, 4 }
 0x402   :  { %v903_v19 = vrot.slane %v902_v16, 2  ;;  %v911_v57 = vadd.f32 %v910_v18, %v909_v13 }
 0x404   :  { %v904_v21 = vadd.f32 %v903_v19, %v902_v16  ;;  %v912_v22 = vrot.slane %v911_v57, 2 }
 0x406   :  { %v905_v25 = vrot.slane %v904_v21, 1  ;;  %v913_v56 = vadd.f32 %v912_v22, %v911_v57 }
 0x408   :  { %v914_v27 = vrot.slane %v913_v56, 1  ;;  %v906_v28 = vadd.f32 %v905_v25, %v904_v21 }
 0x40a   :  { %v915_v31 = vadd.f32 %v914_v27, %v913_v56 }
 0x40c   :  { %v916_v58 = vsel %vm286_vm1, %v906_v28, %v915_v31 }
 0x40d   :  { %1614 = vmatmul.mubr.f32.vlgmr.msra.gmra.mrb[8].mxu0 %v916_v58 }
 0x4e0   :  { %v983_v33 = vpop.f32.mrb[8].mxu0 }
 0x4e1   :  { %v987_v3 = vmul.f32 0.001953125, %v983_v33  ;;  %v1615_v4 = vpop.f32.mrb[9].mxu0 }
 0x4e3   :  { %v988_v34 = vmul.f32 %v987_v3, %v987_v3 }
 0x4e5   :  { %v990_v37 = vrot.slane %v988_v34, 7 }
 0x4e7   :  { %v992_v38 = vsub.f32 %v987_v3, %v990_v37 }
 0x4e9   :  { %v993_v39 = vadd.f32 1e-05, %v992_v38 }
 0x4eb   :  { %1867 = vrsqrt.f32 %v993_v39 }
 0x4f5   :  { %v1868_v15 = vpop.eup %1867 }
 0x4f6   :  { %v1002_v40 = vrot.slane %v1868_v15, %v2261_v9 }
 0x4f8   :  { %v1003_v42 = vcombine.high %v1002_v40, %v1002_v40 }
 0x4fa   :  { %v1010_v17 = vrot.slane %v1003_v42, %v2261_v9 }
 0x4fc   :  { %v1012_v44 = vmul.f32 %v1010_v17, %v898_v43 }
 0x4fe   :  { %v1013_v20 = vmul.f32 %v1012_v44, %v987_v3 }
 0x500   :  { %v1014_v45 = vsub.f32 %v899_v41, %v1013_v20 }
 0x502   :  { %v1019_v46 = vrot.slane %v1014_v45, %v2272_v24 }
 0x504   :  { %v1021_v23 = vsel %vm286_vm1, %v1012_v44, %v1019_v46 }
 0x505   :  { %1619 = vmatmul.mubr.msk.f32.vlgmr.msra.gmra.mrb[8].mxu1 %vm507_vm8, %v1021_v23 }
 0x5d8   :  { %v1091_v47 = vpop.f32.mrb[8].mxu1 }
 0x5d9   :  { %v1098_v26 = vrot.slane %v1091_v47, %v2272_v24  ;;  %v1620_v29 = vpop.f32.mrb[9].mxu1  ;;  %v1104_v9 = vrot.slane %v1091_v47, %v593_v8 }
 0x5db   :  { %v1099_v48 = vmul.f32 %v1098_v26, %v896_v6  ;;  %v1100_v49 = vmul.f32 %v1098_v26, %v897_v2 }
 0x5dd   :  { %v1105_v51 = vadd.f32 %v1104_v9, %v1099_v48  ;;  %v1106_v32 = vadd.f32 %v1104_v9, %v1100_v49 }
 0x5df   :  { %v1107_v52 = vadd.f32 %v1105_v51, %v1956_v14  ;;  %v1108_v10 = vadd.f32 %v1106_v32, %v2041_v54 }
 0x5e1   :  { %v1109_v53 = vmax.f32 %v1107_v52, 0.0  ;;  %v1110_v36 = vmax.f32 %v1108_v10, 0.0 }
 0x5e3   :  { %1111 = vst [vmem:[%s2452_s9] sm:$0xff] %v1109_v53  ;;  %1112 = vst [vmem:[%s2452_s9 + $0x8] sm:$0xff] %v1110_v36 }

</bundles_post_ra>
